<compile_context>
chip_gen: v5e
topology: v5e:2x2
jax: 0.10.0
libtpu: 0.0.40
codegen_flags: <defaults>
</compile_context>

<pallas_src>
import functools

import jax
import jax.numpy as jnp
from jax.experimental import pallas as pl
from jax.experimental.pallas import tpu as pltpu


def _round_up(v, m):
    return (v + m - 1) // m * m


def _pick_tiling(n, tile_m=None, tile_k=None):
    """Padded node count + (row, reduction) tile sizes.

    * A-tile DMAs should be large (>=512 KiB): 128-wide tiles reach ~29% of HBM roofline vs ~85%+
      at 512+.
    * Prefer padding n up to a coarse granule over shrinking tiles to make them divide n_pad.
    * Cap the row tile at n_pad/2 so the "parallel" axis has >=2 blocks (v7x megacore) when possible.
    """
    n0 = _round_up(max(n, 1), 128)
    granule = 128 if n0 <= 512 else 512
    n_pad = _round_up(n0, granule)

    def fit(desired):
        t = max(128, (min(desired, n_pad) // 128) * 128)
        while n_pad % t:
            t -= 128
        return t

    tm = fit(tile_m if tile_m is not None else min(512, max(128, n_pad // 2)))
    tk = fit(tile_k if tile_k is not None else 2048)
    return n_pad, tm, tk


def _vmem_limit_bytes(tile_m, tile_k, n_pad, f_pad, width, x_resident, emit_h):
    b = 2 * tile_m * tile_k * 2                                   # A tile, double-buffered bf16
    b += 2 * ((n_pad if x_resident else tile_k) * width * 2)      # aggregation operand (xW_l)
    b += 2 * tile_m * f_pad * 2                                   # x_self, double-buffered bf16
    b += 2 * (f_pad * width * 2 + width * 4 + tile_m * 4)         # W_r, bias, deg^-1
    b += 2 * tile_m * width * 4                                   # z output block (f32)
    if emit_h:
        b += 2 * tile_m * width * 2                               # h output block (bf16)
    return max(int(b * 1.25), 16 << 20)                           # headroom; << v7x's 64 MiB


def _sage_layer_kernel(x_resident, tile_k, emit_h,
                       a_ref, xw_ref, x_self_ref, wr_ref, b_ref, dinv_ref, *out_refs):
    """One SAGEConv layer.

    grid = (row blocks i [parallel], reduction blocks k [arbitrary, innermost]).
    Accumulates  A[i,k] @ (x W_l)[k]  in the resident f32 output block, then finalizes with the
    f32 reciprocal-degree scaling, the self/root matmul and the bias (+ optional relu->bf16 h).
    """
    if emit_h:
        z_ref, h_ref = out_refs
    else:
        (z_ref,) = out_refs
        h_ref = None

    k = pl.program_id(1)

    if x_resident:
        row0 = pl.multiple_of(k * tile_k, tile_k)
        xw = xw_ref[pl.ds(row0, tile_k), :]
    else:
        xw = xw_ref[...]

    part = jnp.dot(a_ref[...], xw, preferred_element_type=jnp.float32)

    @pl.when(k == 0)
    def _init():
        z_ref[...] = part

    @pl.when(k > 0)
    def _accum():
        z_ref[...] += part

    @pl.when(k == pl.num_programs(1) - 1)
    def _finalize():
        z = (z_ref[...] * dinv_ref[...]
             + jnp.dot(x_self_ref[...], wr_ref[...], preferred_element_type=jnp.float32)
             + b_ref[...])
        z_ref[...] = z
        if emit_h:
            h_ref[...] = jnp.maximum(z, 0.0).astype(h_ref.dtype)


def _sage_layer(a01, xw, x_self, w_r, bias, dinv, tile_m, tile_k, *, emit_h):
    n_pad = a01.shape[0]
    f_pad = x_self.shape[1]
    width = xw.shape[1]
    grid = (n_pad // tile_m, n_pad // tile_k)

    # Keep the aggregation operand whole-array VMEM resident when it is small enough; the constant
    # block index means it is DMA'd once per layer instead of once per (i, k) step.
    x_resident = (n_pad * width * 2) <= (8 << 20)
    if x_resident:
        xw_spec = pl.BlockSpec((n_pad, width), lambda i, k: (0, 0))
    else:
        xw_spec = pl.BlockSpec((tile_k, width), lambda i, k: (k, 0))

    z_shape = jax.ShapeDtypeStruct((n_pad, width), jnp.float32)
    z_spec = pl.BlockSpec((tile_m, width), lambda i, k: (i, 0))
    if emit_h:
        out_shape = (z_shape, jax.ShapeDtypeStruct((n_pad, width), jnp.bfloat16))
        out_specs = [z_spec, pl.BlockSpec((tile_m, width), lambda i, k: (i, 0))]
    else:
        out_shape = z_shape
        out_specs = z_spec

    kernel = functools.partial(_sage_layer_kernel, x_resident, tile_k, emit_h)

    outs = pl.pallas_call(
        kernel,
        out_shape=out_shape,
        grid_spec=pltpu.PrefetchScalarGridSpec(
            num_scalar_prefetch=0,
            grid=grid,
            in_specs=[
                pl.BlockSpec((tile_m, tile_k), lambda i, k: (i, k)),   # A tile (bf16, 0/1)
                xw_spec,                                               # x @ W_l (bf16)
                pl.BlockSpec((tile_m, f_pad), lambda i, k: (i, 0)),    # x rows (root/self path)
                pl.BlockSpec((f_pad, width), lambda i, k: (0, 0)),     # W_r (bf16)
                pl.BlockSpec((1, width), lambda i, k: (0, 0)),         # bias (f32)
                pl.BlockSpec((tile_m, 1), lambda i, k: (i, 0)),        # 1/deg (f32)
            ],
            out_specs=out_specs,
        ),
        compiler_params=pltpu.CompilerParams(
            dimension_semantics=("parallel", "arbitrary"),
            vmem_limit_bytes=_vmem_limit_bytes(tile_m, tile_k, n_pad, f_pad, width,
                                               x_resident, emit_h),
        ),
    )(a01, xw, x_self, w_r, bias, dinv)
    return outs if emit_h else (outs,)


def mysage_forward(x, edge_index, params, *, tile_m=None, tile_k=None):
    """x: [N, Fin] f32, edge_index: [2, E] int32 (row 0 = src j, row 1 = dst i).

    Returns (out [N, out_channels], z [N, hidden]) matching MYsage.forward with max_depth=2.
    """
    w1l, w1r, b1, w2l, w2r, b2 = params
    n, f_in = x.shape
    hidden = w1l.shape[1]
    out_dim = w2l.shape[1]

    n_pad, tm, tk = _pick_tiling(n, tile_m, tile_k)
    f_pad = _round_up(f_in, 128)
    h_pad = _round_up(hidden, 128)
    o_pad = _round_up(out_dim, 128)

    # Raw 0/1 (with edge multiplicity) adjacency, built directly in bf16 (small integer counts are
    # exact in bf16 -> no quantization of the aggregation weights and no f32 N^2 intermediate).
    src, dst = edge_index[0], edge_index[1]
    a01 = jnp.zeros((n_pad, n_pad), jnp.bfloat16).at[dst, src].add(1.0)
    deg = jnp.zeros((n_pad,), jnp.float32).at[dst].add(1.0)
    dinv = jnp.where(deg > 0, 1.0 / jnp.maximum(deg, 1.0), 0.0).reshape(n_pad, 1)

    # Lane-dense (128-wide) zero-padded activations / parameters.
    x_p = jnp.zeros((n_pad, f_pad), jnp.bfloat16).at[:n, :f_in].set(x.astype(jnp.bfloat16))

    w1l_p = jnp.zeros((f_pad, h_pad), jnp.bfloat16).at[:f_in, :hidden].set(w1l.astype(jnp.bfloat16))
    w1r_p = jnp.zeros((f_pad, h_pad), jnp.bfloat16).at[:f_in, :hidden].set(w1r.astype(jnp.bfloat16))
    b1_p = jnp.zeros((1, h_pad), jnp.float32).at[0, :hidden].set(b1.reshape(-1))

    w2l_p = jnp.zeros((h_pad, o_pad), jnp.bfloat16).at[:hidden, :out_dim].set(w2l.astype(jnp.bfloat16))
    w2r_p = jnp.zeros((h_pad, o_pad), jnp.bfloat16).at[:hidden, :out_dim].set(w2r.astype(jnp.bfloat16))
    b2_p = jnp.zeros((1, o_pad), jnp.float32).at[0, :out_dim].set(b2.reshape(-1))

    # Pre-multiply the aggregation operand by W_l (output width is 128 lanes either way, so the
    # A-reduction traffic is unchanged) so the k loop accumulates A @ (x W_l) directly.
    xw1 = jnp.dot(x_p, w1l_p, preferred_element_type=jnp.float32).astype(jnp.bfloat16)

    # Layer 1: returns pre-activation z (f32) and h = relu(z) in bf16 (fused into the finalize).
    z_pad, h_p = _sage_layer(a01, xw1, x_p, w1r_p, b1_p, dinv, tm, tk, emit_h=True)

    # Layer 2.
    hw2 = jnp.dot(h_p, w2l_p, preferred_element_type=jnp.float32).astype(jnp.bfloat16)
    (out_pad,) = _sage_layer(a01, hw2, h_p, w2r_p, b2_p, dinv, tm, tk, emit_h=False)

    # NOTE: padded rows (n..n_pad) of z/out hold only bias junk; they never contribute to the
    # aggregation (A's padded columns are zero) and are sliced away here.
    return out_pad[:n, :out_dim], z_pad[:n, :hidden]


def _reference(x, edge_index, params, quantize=False):
    """Pure-JAX reference. quantize=True mimics the kernel's bf16 operand rounding exactly."""
    q = (lambda v: v.astype(jnp.bfloat16).astype(jnp.float32)) if quantize else (lambda v: v)
    n = x.shape[0]
    src, dst = edge_index[0], edge_index[1]
    a = jnp.zeros((n, n), jnp.float32).at[dst, src].add(1.0)
    deg = a.sum(axis=1, keepdims=True)
    dinv = jnp.where(deg > 0, 1.0 / jnp.maximum(deg, 1.0), 0.0)
    w1l, w1r, b1, w2l, w2r, b2 = params
    xq = q(x)
    z = (a @ q(xq @ q(w1l))) * dinv + xq @ q(w1r) + b1
    h = q(jax.nn.relu(z))
    out = (a @ q(h @ q(w2l))) * dinv + h @ q(w2r) + b2
    return out, z


if __name__ == "__main__":
    key = jax.random.PRNGKey(0)
    N, E = 8, 24
    in_channels, hidden, out_channels = 4, 32, 16

    k = jax.random.split(key, 9)
    x = jax.random.normal(k[0], (N, in_channels), jnp.float32)
    edge_index = jnp.stack([
        jax.random.randint(k[1], (E,), 0, N),
        jax.random.randint(k[2], (E,), 0, N),
    ]).astype(jnp.int32)

    def lin(kk, fan_in, fan_out):
        bound = 1.0 / jnp.sqrt(fan_in)
        return jax.random.uniform(kk, (fan_in, fan_out), jnp.float32, -bound, bound)

    params = (
        lin(k[3], in_channels, hidden),                                       # W1_l (agg path)
        lin(k[4], in_channels, hidden),                                       # W1_r (root path)
        jax.random.uniform(k[5], (1, hidden), jnp.float32, -0.5, 0.5),        # b1
        lin(k[6], hidden, out_channels),                                      # W2_l
        lin(k[7], hidden, out_channels),                                      # W2_r
        jax.random.uniform(k[8], (1, out_channels), jnp.float32, -0.5, 0.5),  # b2
    )

    fwd = jax.jit(mysage_forward, static_argnames=("tile_m", "tile_k"))

    # Small graph: single tile per layer.
    out, z = jax.block_until_ready(fwd(x, edge_index, params))
    assert out.shape == (N, out_channels) and z.shape == (N, hidden)

    ref_out_q, ref_z_q = _reference(x, edge_index, params, quantize=True)
    assert jnp.allclose(z, ref_z_q, atol=2e-2, rtol=2e-2)
    assert jnp.allclose(out, ref_out_q, atol=2e-2, rtol=2e-2)

    ref_out, ref_z = _reference(x, edge_index, params, quantize=False)
    assert jnp.allclose(z, ref_z, atol=1e-1, rtol=1e-1)
    assert jnp.allclose(out, ref_out, atol=1e-1, rtol=1e-1)

    # Larger graph, default (large) tiles: multiple parallel row blocks + resident agg operand.
    N2, E2 = 1200, 6000
    k2 = jax.random.split(jax.random.PRNGKey(1), 3)
    x2 = jax.random.normal(k2[0], (N2, in_channels), jnp.float32)
    ei2 = jnp.stack([
        jax.random.randint(k2[1], (E2,), 0, N2),
        jax.random.randint(k2[2], (E2,), 0, N2),
    ]).astype(jnp.int32)

    out2, z2 = jax.block_until_ready(fwd(x2, ei2, params))
    assert out2.shape == (N2, out_channels) and z2.shape == (N2, hidden)
    ref_out2, ref_z2 = _reference(x2, ei2, params, quantize=True)
    assert jnp.allclose(z2, ref_z2, atol=2e-2, rtol=2e-2)
    assert jnp.allclose(out2, ref_out2, atol=2e-2, rtol=2e-2)

    # Same graph, explicit smaller tiles: exercises the multi-block k reduction (f32 accumulation
    # in the resident output block) and the in-kernel pl.ds row slicing of the resident operand.
    out3, z3 = jax.block_until_ready(fwd(x2, ei2, params, tile_m=256, tile_k=512))
    assert jnp.allclose(out3, out2, atol=2e-2, rtol=2e-2)
    assert jnp.allclose(z3, z2, atol=2e-2, rtol=2e-2)

    print("KERNEL_OK")
</pallas_src>

<mosaic_0001>
module attributes {stable_mosaic.version = 11 : i64} {
  func.func @_sage_layer_kernel(%arg0: i32, %arg1: i32, %arg2: memref<128x128xbf16, #tpu.memory_space<vmem>>, %arg3: memref<128x128xbf16, #tpu.memory_space<vmem>>, %arg4: memref<128x128xbf16, #tpu.memory_space<vmem>>, %arg5: memref<128x128xbf16, #tpu.memory_space<vmem>>, %arg6: memref<1x128xf32, #tpu.memory_space<vmem>>, %arg7: memref<128x1xf32, #tpu.memory_space<vmem>>, %arg8: memref<128x128xf32, #tpu.memory_space<vmem>>, %arg9: memref<128x128xbf16, #tpu.memory_space<vmem>>) attributes {dimension_semantics = [#tpu.dimension_semantics<parallel>, #tpu.dimension_semantics<arbitrary>], iteration_bounds = array<i64: 1, 1>, scalar_prefetch = 0 : i64, scratch_operands = 0 : i64, tpu.core_type = #tpu.core_type<tc>, window_params = [{transform_indices = @transform_0, window_bounds = array<i64: 128, 128>}, {pipeline_mode = #tpu.pipeline_mode<synchronous>, transform_indices = @transform_1, window_bounds = array<i64: 128, 128>}, {transform_indices = @transform_2, window_bounds = array<i64: 128, 128>}, {pipeline_mode = #tpu.pipeline_mode<synchronous>, transform_indices = @transform_3, window_bounds = array<i64: 128, 128>}, {pipeline_mode = #tpu.pipeline_mode<synchronous>, transform_indices = @transform_4, window_bounds = array<i64: 1, 128>}, {transform_indices = @transform_5, window_bounds = array<i64: 128, 1>}, {transform_indices = @transform_6, window_bounds = array<i64: 128, 128>}, {transform_indices = @transform_7, window_bounds = array<i64: 128, 128>}]} {
    %c128_i32 = arith.constant 128 : i32
    %0 = arith.muli %arg1, %c128_i32 : i32
    %1 = tpu.assume_multiple %0, 128 : i32
    %2 = arith.index_cast %1 : i32 to index
    %c0 = arith.constant 0 : index
    %3 = vector.load %arg3[%2, %c0] : memref<128x128xbf16, #tpu.memory_space<vmem>>, vector<128x128xbf16>
    %c0_0 = arith.constant 0 : index
    %c0_1 = arith.constant 0 : index
    %4 = vector.load %arg2[%c0_0, %c0_1] : memref<128x128xbf16, #tpu.memory_space<vmem>>, vector<128x128xbf16>
    %cst = arith.constant dense<0.000000e+00> : vector<128x128xf32>
    %5 = tpu.matmul %4, %3, %cst {dimension_numbers = #tpu.dot_dimension_numbers<[1], [0], [0], [1], [0, 0, 1, 1], [], []>} : vector<128x128xbf16>, vector<128x128xbf16>, vector<128x128xf32> -> vector<128x128xf32>
    %c0_i32 = arith.constant 0 : i32
    %6 = arith.cmpi eq, %arg1, %c0_i32 : i32
    %7 = arith.extui %6 : i1 to i32
    %c0_i32_2 = arith.constant 0 : i32
    %8 = arith.cmpi ne, %7, %c0_i32_2 : i32
    scf.if %8 {
      %c0_7 = arith.constant 0 : index
      %c0_8 = arith.constant 0 : index
      %15 = vector.load %arg8[%c0_7, %c0_8] : memref<128x128xf32, #tpu.memory_space<vmem>>, vector<128x128xf32>
      tpu.vector_store %arg8[%c0_7, %c0_8], %5 {strides = array<i32>} : memref<128x128xf32, #tpu.memory_space<vmem>>, vector<128x128xf32>,
    } else {
    }
    %c0_i32_3 = arith.constant 0 : i32
    %9 = arith.cmpi sgt, %arg1, %c0_i32_3 : i32
    %10 = arith.extui %9 : i1 to i32
    %c0_i32_4 = arith.constant 0 : i32
    %11 = arith.cmpi ne, %10, %c0_i32_4 : i32
    scf.if %11 {
      %c0_7 = arith.constant 0 : index
      %c0_8 = arith.constant 0 : index
      %15 = vector.load %arg8[%c0_7, %c0_8] : memref<128x128xf32, #tpu.memory_space<vmem>>, vector<128x128xf32>
      %16 = arith.addf %15, %5 : vector<128x128xf32>
      %c0_9 = arith.constant 0 : index
      %c0_10 = arith.constant 0 : index
      %17 = vector.load %arg8[%c0_9, %c0_10] : memref<128x128xf32, #tpu.memory_space<vmem>>, vector<128x128xf32>
      tpu.vector_store %arg8[%c0_9, %c0_10], %16 {strides = array<i32>} : memref<128x128xf32, #tpu.memory_space<vmem>>, vector<128x128xf32>,
    } else {
    }
    %c0_i32_5 = arith.constant 0 : i32
    %12 = arith.cmpi eq, %arg1, %c0_i32_5 : i32
    %13 = arith.extui %12 : i1 to i32
    %c0_i32_6 = arith.constant 0 : i32
    %14 = arith.cmpi ne, %13, %c0_i32_6 : i32
    scf.if %14 {
      %c0_7 = arith.constant 0 : index
      %c0_8 = arith.constant 0 : index
      %15 = vector.load %arg8[%c0_7, %c0_8] : memref<128x128xf32, #tpu.memory_space<vmem>>, vector<128x128xf32>
      %c0_9 = arith.constant 0 : index
      %c0_10 = arith.constant 0 : index
      %16 = vector.load %arg7[%c0_9, %c0_10] : memref<128x1xf32, #tpu.memory_space<vmem>>, vector<128x1xf32>
      %17 = vector.broadcast %16 : vector<128x1xf32> to vector<128x128xf32>
      %18 = arith.mulf %15, %17 : vector<128x128xf32>
      %c0_11 = arith.constant 0 : index
      %c0_12 = arith.constant 0 : index
      %19 = vector.load %arg4[%c0_11, %c0_12] : memref<128x128xbf16, #tpu.memory_space<vmem>>, vector<128x128xbf16>
      %c0_13 = arith.constant 0 : index
      %c0_14 = arith.constant 0 : index
      %20 = vector.load %arg5[%c0_13, %c0_14] : memref<128x128xbf16, #tpu.memory_space<vmem>>, vector<128x128xbf16>
      %cst_15 = arith.constant dense<0.000000e+00> : vector<128x128xf32>
      %21 = tpu.matmul %19, %20, %cst_15 {dimension_numbers = #tpu.dot_dimension_numbers<[1], [0], [0], [1], [0, 0, 1, 1], [], []>} : vector<128x128xbf16>, vector<128x128xbf16>, vector<128x128xf32> -> vector<128x128xf32>
      %22 = arith.addf %18, %21 : vector<128x128xf32>
      %c0_16 = arith.constant 0 : index
      %c0_17 = arith.constant 0 : index
      %23 = vector.load %arg6[%c0_16, %c0_17] : memref<1x128xf32, #tpu.memory_space<vmem>>, vector<1x128xf32>
      %24 = vector.broadcast %23 : vector<1x128xf32> to vector<128x128xf32>
      %25 = arith.addf %22, %24 : vector<128x128xf32>
      %c0_18 = arith.constant 0 : index
      %c0_19 = arith.constant 0 : index
      %26 = vector.load %arg8[%c0_18, %c0_19] : memref<128x128xf32, #tpu.memory_space<vmem>>, vector<128x128xf32>
      tpu.vector_store %arg8[%c0_18, %c0_19], %25 {strides = array<i32>} : memref<128x128xf32, #tpu.memory_space<vmem>>, vector<128x128xf32>,
      %cst_20 = arith.constant 0.000000e+00 : f32
      %27 = vector.broadcast %cst_20 : f32 to vector<128x128xf32>
      %28 = arith.maximumf %25, %27 : vector<128x128xf32>
      %29 = arith.truncf %28 : vector<128x128xf32> to vector<128x128xbf16>
      %c0_21 = arith.constant 0 : index
      %c0_22 = arith.constant 0 : index
      %30 = vector.load %arg9[%c0_21, %c0_22] : memref<128x128xbf16, #tpu.memory_space<vmem>>, vector<128x128xbf16>
      tpu.vector_store %arg9[%c0_21, %c0_22], %29 {strides = array<i32>} : memref<128x128xbf16, #tpu.memory_space<vmem>>, vector<128x128xbf16>,
    } else {
    }
    return
  }
  func.func @transform_0(%arg0: i32, %arg1: i32) -> (i32, i32) {
    %c0_i32 = arith.constant 0 : i32
    return %arg0, %arg1 : i32, i32
  }
  func.func @transform_1(%arg0: i32, %arg1: i32) -> (i32, i32) {
    %c0_i32 = arith.constant 0 : i32
    %c0_i32_0 = arith.constant 0 : i32
    %c0_i32_1 = arith.constant 0 : i32
    return %c0_i32, %c0_i32_0 : i32, i32
  }
  func.func @transform_2(%arg0: i32, %arg1: i32) -> (i32, i32) {
    %c0_i32 = arith.constant 0 : i32
    %c0_i32_0 = arith.constant 0 : i32
    return %arg0, %c0_i32 : i32, i32
  }
  func.func @transform_3(%arg0: i32, %arg1: i32) -> (i32, i32) {
    %c0_i32 = arith.constant 0 : i32
    %c0_i32_0 = arith.constant 0 : i32
    %c0_i32_1 = arith.constant 0 : i32
    return %c0_i32, %c0_i32_0 : i32, i32
  }
  func.func @transform_4(%arg0: i32, %arg1: i32) -> (i32, i32) {
    %c0_i32 = arith.constant 0 : i32
    %c0_i32_0 = arith.constant 0 : i32
    %c0_i32_1 = arith.constant 0 : i32
    return %c0_i32, %c0_i32_0 : i32, i32
  }
  func.func @transform_5(%arg0: i32, %arg1: i32) -> (i32, i32) {
    %c0_i32 = arith.constant 0 : i32
    %c0_i32_0 = arith.constant 0 : i32
    return %arg0, %c0_i32 : i32, i32
  }
  func.func @transform_6(%arg0: i32, %arg1: i32) -> (i32, i32) {
    %c0_i32 = arith.constant 0 : i32
    %c0_i32_0 = arith.constant 0 : i32
    return %arg0, %c0_i32 : i32, i32
  }
  func.func @transform_7(%arg0: i32, %arg1: i32) -> (i32, i32) {
    %c0_i32 = arith.constant 0 : i32
    %c0_i32_0 = arith.constant 0 : i32
    return %arg0, %c0_i32 : i32, i32
  }
}

module attributes {stable_mosaic.version = 11 : i64} {
  func.func @_sage_layer_kernel(%arg0: i32, %arg1: i32, %arg2: memref<128x128xbf16, #tpu.memory_space<vmem>>, %arg3: memref<128x128xbf16, #tpu.memory_space<vmem>>, %arg4: memref<128x128xbf16, #tpu.memory_space<vmem>>, %arg5: memref<128x128xbf16, #tpu.memory_space<vmem>>, %arg6: memref<1x128xf32, #tpu.memory_space<vmem>>, %arg7: memref<128x1xf32, #tpu.memory_space<vmem>>, %arg8: memref<128x128xf32, #tpu.memory_space<vmem>>) attributes {dimension_semantics = [#tpu.dimension_semantics<parallel>, #tpu.dimension_semantics<arbitrary>], iteration_bounds = array<i64: 1, 1>, scalar_prefetch = 0 : i64, scratch_operands = 0 : i64, tpu.core_type = #tpu.core_type<tc>, window_params = [{transform_indices = @transform_0, window_bounds = array<i64: 128, 128>}, {pipeline_mode = #tpu.pipeline_mode<synchronous>, transform_indices = @transform_1, window_bounds = array<i64: 128, 128>}, {transform_indices = @transform_2, window_bounds = array<i64: 128, 128>}, {pipeline_mode = #tpu.pipeline_mode<synchronous>, transform_indices = @transform_3, window_bounds = array<i64: 128, 128>}, {pipeline_mode = #tpu.pipeline_mode<synchronous>, transform_indices = @transform_4, window_bounds = array<i64: 1, 128>}, {transform_indices = @transform_5, window_bounds = array<i64: 128, 1>}, {transform_indices = @transform_6, window_bounds = array<i64: 128, 128>}]} {
    %c128_i32 = arith.constant 128 : i32
    %0 = arith.muli %arg1, %c128_i32 : i32
    %1 = tpu.assume_multiple %0, 128 : i32
    %2 = arith.index_cast %1 : i32 to index
    %c0 = arith.constant 0 : index
    %3 = vector.load %arg3[%2, %c0] : memref<128x128xbf16, #tpu.memory_space<vmem>>, vector<128x128xbf16>
    %c0_0 = arith.constant 0 : index
    %c0_1 = arith.constant 0 : index
    %4 = vector.load %arg2[%c0_0, %c0_1] : memref<128x128xbf16, #tpu.memory_space<vmem>>, vector<128x128xbf16>
    %cst = arith.constant dense<0.000000e+00> : vector<128x128xf32>
    %5 = tpu.matmul %4, %3, %cst {dimension_numbers = #tpu.dot_dimension_numbers<[1], [0], [0], [1], [0, 0, 1, 1], [], []>} : vector<128x128xbf16>, vector<128x128xbf16>, vector<128x128xf32> -> vector<128x128xf32>
    %c0_i32 = arith.constant 0 : i32
    %6 = arith.cmpi eq, %arg1, %c0_i32 : i32
    %7 = arith.extui %6 : i1 to i32
    %c0_i32_2 = arith.constant 0 : i32
    %8 = arith.cmpi ne, %7, %c0_i32_2 : i32
    scf.if %8 {
      %c0_7 = arith.constant 0 : index
      %c0_8 = arith.constant 0 : index
      %15 = vector.load %arg8[%c0_7, %c0_8] : memref<128x128xf32, #tpu.memory_space<vmem>>, vector<128x128xf32>
      tpu.vector_store %arg8[%c0_7, %c0_8], %5 {strides = array<i32>} : memref<128x128xf32, #tpu.memory_space<vmem>>, vector<128x128xf32>,
    } else {
    }
    %c0_i32_3 = arith.constant 0 : i32
    %9 = arith.cmpi sgt, %arg1, %c0_i32_3 : i32
    %10 = arith.extui %9 : i1 to i32
    %c0_i32_4 = arith.constant 0 : i32
    %11 = arith.cmpi ne, %10, %c0_i32_4 : i32
    scf.if %11 {
      %c0_7 = arith.constant 0 : index
      %c0_8 = arith.constant 0 : index
      %15 = vector.load %arg8[%c0_7, %c0_8] : memref<128x128xf32, #tpu.memory_space<vmem>>, vector<128x128xf32>
      %16 = arith.addf %15, %5 : vector<128x128xf32>
      %c0_9 = arith.constant 0 : index
      %c0_10 = arith.constant 0 : index
      %17 = vector.load %arg8[%c0_9, %c0_10] : memref<128x128xf32, #tpu.memory_space<vmem>>, vector<128x128xf32>
      tpu.vector_store %arg8[%c0_9, %c0_10], %16 {strides = array<i32>} : memref<128x128xf32, #tpu.memory_space<vmem>>, vector<128x128xf32>,
    } else {
    }
    %c0_i32_5 = arith.constant 0 : i32
    %12 = arith.cmpi eq, %arg1, %c0_i32_5 : i32
    %13 = arith.extui %12 : i1 to i32
    %c0_i32_6 = arith.constant 0 : i32
    %14 = arith.cmpi ne, %13, %c0_i32_6 : i32
    scf.if %14 {
      %c0_7 = arith.constant 0 : index
      %c0_8 = arith.constant 0 : index
      %15 = vector.load %arg8[%c0_7, %c0_8] : memref<128x128xf32, #tpu.memory_space<vmem>>, vector<128x128xf32>
      %c0_9 = arith.constant 0 : index
      %c0_10 = arith.constant 0 : index
      %16 = vector.load %arg7[%c0_9, %c0_10] : memref<128x1xf32, #tpu.memory_space<vmem>>, vector<128x1xf32>
      %17 = vector.broadcast %16 : vector<128x1xf32> to vector<128x128xf32>
      %18 = arith.mulf %15, %17 : vector<128x128xf32>
      %c0_11 = arith.constant 0 : index
      %c0_12 = arith.constant 0 : index
      %19 = vector.load %arg4[%c0_11, %c0_12] : memref<128x128xbf16, #tpu.memory_space<vmem>>, vector<128x128xbf16>
      %c0_13 = arith.constant 0 : index
      %c0_14 = arith.constant 0 : index
      %20 = vector.load %arg5[%c0_13, %c0_14] : memref<128x128xbf16, #tpu.memory_space<vmem>>, vector<128x128xbf16>
      %cst_15 = arith.constant dense<0.000000e+00> : vector<128x128xf32>
      %21 = tpu.matmul %19, %20, %cst_15 {dimension_numbers = #tpu.dot_dimension_numbers<[1], [0], [0], [1], [0, 0, 1, 1], [], []>} : vector<128x128xbf16>, vector<128x128xbf16>, vector<128x128xf32> -> vector<128x128xf32>
      %22 = arith.addf %18, %21 : vector<128x128xf32>
      %c0_16 = arith.constant 0 : index
      %c0_17 = arith.constant 0 : index
      %23 = vector.load %arg6[%c0_16, %c0_17] : memref<1x128xf32, #tpu.memory_space<vmem>>, vector<1x128xf32>
      %24 = vector.broadcast %23 : vector<1x128xf32> to vector<128x128xf32>
      %25 = arith.addf %22, %24 : vector<128x128xf32>
      %c0_18 = arith.constant 0 : index
      %c0_19 = arith.constant 0 : index
      %26 = vector.load %arg8[%c0_18, %c0_19] : memref<128x128xf32, #tpu.memory_space<vmem>>, vector<128x128xf32>
      tpu.vector_store %arg8[%c0_18, %c0_19], %25 {strides = array<i32>} : memref<128x128xf32, #tpu.memory_space<vmem>>, vector<128x128xf32>,
    } else {
    }
    return
  }
  func.func @transform_0(%arg0: i32, %arg1: i32) -> (i32, i32) {
    %c0_i32 = arith.constant 0 : i32
    return %arg0, %arg1 : i32, i32
  }
  func.func @transform_1(%arg0: i32, %arg1: i32) -> (i32, i32) {
    %c0_i32 = arith.constant 0 : i32
    %c0_i32_0 = arith.constant 0 : i32
    %c0_i32_1 = arith.constant 0 : i32
    return %c0_i32, %c0_i32_0 : i32, i32
  }
  func.func @transform_2(%arg0: i32, %arg1: i32) -> (i32, i32) {
    %c0_i32 = arith.constant 0 : i32
    %c0_i32_0 = arith.constant 0 : i32
    return %arg0, %c0_i32 : i32, i32
  }
  func.func @transform_3(%arg0: i32, %arg1: i32) -> (i32, i32) {
    %c0_i32 = arith.constant 0 : i32
    %c0_i32_0 = arith.constant 0 : i32
    %c0_i32_1 = arith.constant 0 : i32
    return %c0_i32, %c0_i32_0 : i32, i32
  }
  func.func @transform_4(%arg0: i32, %arg1: i32) -> (i32, i32) {
    %c0_i32 = arith.constant 0 : i32
    %c0_i32_0 = arith.constant 0 : i32
    %c0_i32_1 = arith.constant 0 : i32
    return %c0_i32, %c0_i32_0 : i32, i32
  }
  func.func @transform_5(%arg0: i32, %arg1: i32) -> (i32, i32) {
    %c0_i32 = arith.constant 0 : i32
    %c0_i32_0 = arith.constant 0 : i32
    return %arg0, %c0_i32 : i32, i32
  }
  func.func @transform_6(%arg0: i32, %arg1: i32) -> (i32, i32) {
    %c0_i32 = arith.constant 0 : i32
    %c0_i32_0 = arith.constant 0 : i32
    return %arg0, %c0_i32 : i32, i32
  }
}

</mosaic_0001>

<bundles_post_ra>
// kernel: mysage_forward.2
= control target key start
LH: loop header
LB: loop body
LE: loop exit
PB: predicated region body
PF: predicated region fallthrough
CT: control target
= control target key end

     0   :  { %v925_v2 = vmov 0   ;;  %s1215_s1 = inlined_call_operand.vmem [shape: bf16[128,128], index: 1, kind: input, shape index: {}]   ;;  %s1216_s3 = inlined_call_operand.vmem [shape: bf16[128,128], index: 3, kind: input, shape index: {}]   ;;  %s1217_s5 = inlined_call_operand.vmem [shape: f32[128,1], index: 5, kind: input, shape index: {}]   ;;  %s1218_s0 = inlined_call_operand.vmem [shape: bf16[128,128], index: 0, kind: input, shape index: {}]   ;;  %s1219_s2 = inlined_call_operand.vmem [shape: bf16[128,128], index: 2, kind: input, shape index: {}]   ;;  %s1220_s4 = inlined_call_operand.vmem [shape: f32[1,128], index: 4, kind: input, shape index: {}]   ;;  %s1221_s6 = inlined_call_operand.vmem [shape: f32[128,128], index: 6, kind: output, shape index: {0}]   ;;  %s1222_s7 = inlined_call_operand.vmem [shape: bf16[128,128], index: 7, kind: output, shape index: {1}]  }
   0x1   :  { %v832_v0 = vld [vmem:[%s1215_s1 + $0x38] sm:$0xff]  ;;  %921 = vset.pattern.permute.xlu0 %v925_v2  ;;  %922 = vset.pattern.permute.xlu1 %v925_v2  ;;  %v831_v3 = vld [vmem:[%s1215_s1 + $0x30] sm:$0xff]  ;;  %v830_v5 = vld [vmem:[%s1215_s1 + $0x28] sm:$0xff] }
   0x2   :  { %v856_v1 = vld [vmem:[%s1216_s3 + $0x38] sm:$0xff]  ;;  %923 = vset.pattern.permute.xlu2 %v925_v2  ;;  %158 = vmatpush.bf16.msra.mxu0 %v832_v0  ;;  %v855_v4 = vld [vmem:[%s1216_s3 + $0x30] sm:$0xff]  ;;  %v298_v6 = vld [vmem:[%s1217_s5] sm:$0xff] }
   0x3   :  { %904 = vmatpush.bf16.msra.mxu2 %v832_v0  ;;  %912 = vmatpush.bf16.msra.mxu3 %v856_v1  ;;  %v854_v7 = vld [vmem:[%s1216_s3 + $0x28] sm:$0xff]  ;;  %v829_v8 = vld [vmem:[%s1215_s1 + $0x20] sm:$0xff]  ;;  %v300_v9 = vld [vmem:[%s1217_s5 + $0x10] sm:$0xff] }
   0x4   :  { %538 = vmatpush.bf16.msra.mxu1 %v856_v1  ;;  %316 = vperm.xlu0 %921, %v298_v6   ;;  %v853_v10 = vld [vmem:[%s1216_s3 + $0x20] sm:$0xff]  ;;  %v299_v11 = vld [vmem:[%s1217_s5 + $0x8] sm:$0xff]  ;;  %v828_v12 = vld [vmem:[%s1215_s1 + $0x18] sm:$0xff] }
   0x5   :  { %326 = vperm.xlu1 %922, %v300_v9   ;;  %v852_v13 = vld [vmem:[%s1216_s3 + $0x18] sm:$0xff]  ;;  %v827_v14 = vld [vmem:[%s1215_s1 + $0x10] sm:$0xff]  ;;  %v826_v18 = vld [vmem:[%s1215_s1 + $0x8] sm:$0xff] }
   0x6   :  { %159 = vmatpush.bf16.msra.mxu0 %v831_v3  ;;  %v301_v15 = vld [vmem:[%s1217_s5 + $0x18] sm:$0xff]  ;;  %v851_v16 = vld [vmem:[%s1216_s3 + $0x10] sm:$0xff]  ;;  %v850_v19 = vld [vmem:[%s1216_s3 + $0x8] sm:$0xff] }
   0x7   :  { %905 = vmatpush.bf16.msra.mxu2 %v831_v3  ;;  %913 = vmatpush.bf16.msra.mxu3 %v855_v4  ;;  %v304_v17 = vld [vmem:[%s1217_s5 + $0x30] sm:$0xff]  ;;  %v825_v20 = vld [vmem:[%s1215_s1] sm:$0xff]  ;;  %v305_v22 = vld [vmem:[%s1217_s5 + $0x38] sm:$0xff] }
   0x8   :  { %539 = vmatpush.bf16.msra.mxu1 %v855_v4  ;;  %v302_v21 = vld [vmem:[%s1217_s5 + $0x20] sm:$0xff]  ;;  %v307_v26 = vld [vmem:[%s1217_s5 + $0x48] sm:$0xff]  ;;  %v308_v30 = vld [vmem:[%s1217_s5 + $0x50] sm:$0xff] }
   0x9   :  { %v849_v23 = vld [vmem:[%s1216_s3] sm:$0xff]  ;;  %336 = vperm.xlu2 %923, %v302_v21   ;;  %v303_v29 = vld [vmem:[%s1217_s5 + $0x28] sm:$0xff]  ;;  %v313_v36 = vld [vmem:[%s1217_s5 + $0x78] sm:$0xff] }
   0xa   :  { %160 = vmatpush.bf16.msra.mxu0 %v830_v5  ;;  %v833_v24 = vld [vmem:[%s1218_s0] sm:$0xff]  ;;  %v311_v33 = vld [vmem:[%s1217_s5 + $0x68] sm:$0xff]  ;;  %v309_v39 = vld [vmem:[%s1217_s5 + $0x58] sm:$0xff] }
   0xb   :  { %906 = vmatpush.bf16.msra.mxu2 %v830_v5  ;;  %914 = vmatpush.bf16.msra.mxu3 %v854_v7  ;;  %v837_v25 = vld [vmem:[%s1218_s0 + $0x20] sm:$0xff]  ;;  %v834_v34 = vld [vmem:[%s1218_s0 + $0x8] sm:$0xff]  ;;  %v312_v40 = vld [vmem:[%s1217_s5 + $0x70] sm:$0xff] }
   0xc   :  { %540 = vmatpush.bf16.msra.mxu1 %v854_v7  ;;  %321 = vperm.xlu0 %921, %v299_v11   ;;  %v845_v27 = vld [vmem:[%s1219_s2 + $0x20] sm:$0xff]  ;;  %v838_v35 = vld [vmem:[%s1218_s0 + $0x28] sm:$0xff]  ;;  %v835_v41 = vld [vmem:[%s1218_s0 + $0x10] sm:$0xff] }
   0xd   :  { %331 = vperm.xlu1 %922, %v301_v15   ;;  %v841_v28 = vld [vmem:[%s1219_s2] sm:$0xff]  ;;  %v846_v37 = vld [vmem:[%s1219_s2 + $0x28] sm:$0xff]  ;;  %v839_v42 = vld [vmem:[%s1218_s0 + $0x30] sm:$0xff] }
   0xe   :  { %161 = vmatpush.bf16.msra.mxu0 %v829_v8  ;;  %v310_v31 = vld [vmem:[%s1217_s5 + $0x60] sm:$0xff]  ;;  %v842_v38 = vld [vmem:[%s1219_s2 + $0x8] sm:$0xff]  ;;  %v847_v43 = vld [vmem:[%s1219_s2 + $0x30] sm:$0xff] }
   0xf   :  { %907 = vmatpush.bf16.msra.mxu2 %v829_v8  ;;  %915 = vmatpush.bf16.msra.mxu3 %v853_v10  ;;  %v306_v32 = vld [vmem:[%s1217_s5 + $0x40] sm:$0xff]  ;;  %v843_v44 = vld [vmem:[%s1219_s2 + $0x10] sm:$0xff]  ;;  %v836_v45 = vld [vmem:[%s1218_s0 + $0x18] sm:$0xff] }
  0x10   :  { %541 = vmatpush.bf16.msra.mxu1 %v853_v10  ;;  %v840_v46 = vld [vmem:[%s1218_s0 + $0x38] sm:$0xff]  ;;  %v1117_v58 = vld [vmem:[%s1220_s4] ss:$0 sm:$0xff] }
  0x11   :  { %341 = vperm.xlu2 %923, %v303_v29   ;;  %v848_v47 = vld [vmem:[%s1219_s2 + $0x38] sm:$0xff] }
  0x12   :  { %162 = vmatpush.bf16.msra.mxu0 %v828_v12  ;;  %v844_v48 = vld [vmem:[%s1219_s2 + $0x18] sm:$0xff] }
  0x13   :  { %908 = vmatpush.bf16.msra.mxu2 %v828_v12  ;;  %916 = vmatpush.bf16.msra.mxu3 %v852_v13 }
  0x14   :  { %542 = vmatpush.bf16.msra.mxu1 %v852_v13  ;;  %346 = vperm.xlu0 %921, %v304_v17  }
  0x15   :  { %351 = vperm.xlu1 %922, %v305_v22  }
  0x16   :  { %163 = vmatpush.bf16.msra.mxu0 %v827_v14 }
  0x17   :  { %909 = vmatpush.bf16.msra.mxu2 %v827_v14  ;;  %917 = vmatpush.bf16.msra.mxu3 %v851_v16 }
  0x18   :  { %543 = vmatpush.bf16.msra.mxu1 %v851_v16 }
  0x19   :  { %356 = vperm.xlu2 %923, %v306_v32  }
  0x1a   :  { %164 = vmatpush.bf16.msra.mxu0 %v826_v18 }
  0x1b   :  { %910 = vmatpush.bf16.msra.mxu2 %v826_v18  ;;  %918 = vmatpush.bf16.msra.mxu3 %v850_v19 }
  0x1c   :  { %544 = vmatpush.bf16.msra.mxu1 %v850_v19  ;;  %361 = vperm.xlu0 %921, %v307_v26  }
  0x1d   :  { %366 = vperm.xlu1 %922, %v308_v30  }
  0x1e   :  { %165 = vmatpush.bf16.msra.mxu0 %v825_v20 }
  0x1f   :  { %911 = vmatpush.bf16.msra.mxu2 %v825_v20  ;;  %919 = vmatpush.bf16.msra.mxu3 %v849_v23 }
  0x20   :  { %545 = vmatpush.bf16.msra.mxu1 %v849_v23 }
  0x21   :  { %166 = vmatmul.bf16.vlgmr.msra.gmra.mxu0 %v833_v24  ;;  %371 = vperm.xlu2 %923, %v309_v39  }
  0x22   :  { %186 = vmatmul.bf16.vlgmr.msra.gmra.mxu2 %v837_v25  ;;  %566 = vmatmul.bf16.vlgmr.msra.gmra.mxu3 %v845_v27 }
  0x23   :  { %546 = vmatmul.bf16.vlgmr.msra.gmra.mxu1 %v841_v28 }
  0x24   :  { %376 = vperm.xlu0 %921, %v310_v31  }
  0x25   :  { %381 = vperm.xlu1 %922, %v311_v33  }
  0x29   :  { %386 = vperm.xlu2 %923, %v312_v40  }
  0x2c   :  { %391 = vperm.xlu0 %921, %v313_v36  }
  0x31   :  { %171 = vmatmul.bf16.gmra.mxu0 %v834_v34 }
  0x32   :  { %191 = vmatmul.bf16.gmra.mxu2 %v838_v35  ;;  %571 = vmatmul.bf16.gmra.mxu3 %v846_v37 }
  0x33   :  { %551 = vmatmul.bf16.gmra.mxu1 %v842_v38 }
  0x41   :  { %176 = vmatmul.bf16.gmra.mxu0 %v835_v41 }
  0x42   :  { %196 = vmatmul.bf16.gmra.mxu2 %v839_v42  ;;  %576 = vmatmul.bf16.gmra.mxu3 %v847_v43 }
  0x43   :  { %556 = vmatmul.bf16.gmra.mxu1 %v843_v44 }
  0x51   :  { %181 = vmatmul.bf16.gmra.mxu0 %v836_v45 }
  0x52   :  { %201 = vmatmul.bf16.gmra.mxu2 %v840_v46  ;;  %581 = vmatmul.bf16.gmra.mxu3 %v848_v47 }
  0x53   :  { %561 = vmatmul.bf16.gmra.mxu1 %v844_v48 }
  0x63   :  { %v1110_v50 = vpop.permute.xlu2 %336 }
  0x6b   :  { %v1112_v53 = vpop.permute.xlu2 %341 }
  0x73   :  { %v357_v61 = vpop.permute.xlu2 %356 }
  0x76   :  { %v317_v49 = vpop.permute.xlu0 %316 }
  0x77   :  { %v327_v51 = vpop.permute.xlu1 %326 }
  0x7b   :  { %v372_v38 = vpop.permute.xlu2 %371 }
  0x7e   :  { %v322_v52 = vpop.permute.xlu0 %321 }
  0x7f   :  { %v332_v55 = vpop.permute.xlu1 %331 }
  0x86   :  { %v1119_v60 = vpop.permute.xlu0 %346 }
  0x87   :  { %v1125_v6 = vpop.permute.xlu1 %351 }
  0x8e   :  { %v362_v10 = vpop.permute.xlu0 %361 }
  0x8f   :  { %v367_v23 = vpop.permute.xlu1 %366 }
  0x9e   :  { %v167_v54 = vpop.f32.mrf.mxu0 }
  0x9f   :  { %v394_v56 = vmul.f32 %v317_v49, %v167_v54 }
  0xa0   :  { %v547_v57 = vpop.f32.mrf.mxu1 }
  0xa1   :  { %v587_v59 = vadd.f32 %v547_v57, %v394_v56  ;;  %v377_v56 = vpop.permute.xlu0 %376 }
  0xa3   :  { %v607_v62 = vadd.f32 %v1117_v58, %v587_v59 }
  0xa5   :  { %v187_v63 = vpop.f32.mrf.mxu2  ;;  %623 = vst [vmem:[%s1221_s6] sm:$0xff] %v607_v62  ;;  %v567_v0 = vpop.f32.mrf.mxu3  ;;  %v639_v12 = vmax.f32 %v607_v62, 0.0 }
  0xa6   :  { %v402_v1 = vmul.f32 %v357_v61, %v187_v63  ;;  %v169_v2 = vpop.f32.mrf.mxu0 }
  0xa7   :  { %v395_v4 = vmul.f32 %v322_v52, %v169_v2 }
  0xa8   :  { %v595_v3 = vadd.f32 %v567_v0, %v402_v1  ;;  %v549_v5 = vpop.f32.mrf.mxu1 }
  0xa9   :  { %v588_v8 = vadd.f32 %v549_v5, %v395_v4  ;;  %v382_v5 = vpop.permute.xlu1 %381 }
  0xaa   :  { %v615_v7 = vadd.f32 %v1117_v58, %v595_v3 }
  0xab   :  { %v608_v9 = vadd.f32 %v1117_v58, %v588_v8 }
  0xac   :  { %631 = vst [vmem:[%s1221_s6 + $0x40] sm:$0xff] %v615_v7  ;;  %v647_v24 = vmax.f32 %v615_v7, 0.0 }
  0xad   :  { %v189_v11 = vpop.f32.mrf.mxu2  ;;  %624 = vst [vmem:[%s1221_s6 + $0x8] sm:$0xff] %v608_v9  ;;  %v640_v13 = vmax.f32 %v608_v9, 0.0  ;;  %v569_v15 = vpop.f32.mrf.mxu3 }
  0xae   :  { %v403_v14 = vmul.f32 %v362_v10, %v189_v11  ;;  %v172_v16 = vpop.f32.mrf.mxu0 }
  0xaf   :  { %v860_v17 = vpack.c.bf16 %v640_v13, %v639_v12  ;;  %v396_v19 = vmul.f32 %v327_v51, %v172_v16 }
  0xb0   :  { %v596_v18 = vadd.f32 %v569_v15, %v403_v14  ;;  %v552_v20 = vpop.f32.mrf.mxu1 }
  0xb1   :  { %861 = vst [vmem:[%s1222_s7] sm:$0xff] %v860_v17   ;;  %v589_v22 = vadd.f32 %v552_v20, %v396_v19 }
  0xb2   :  { %v616_v21 = vadd.f32 %v1117_v58, %v596_v18 }
  0xb3   :  { %v609_v26 = vadd.f32 %v1117_v58, %v589_v22 }
  0xb4   :  { %632 = vst [vmem:[%s1221_s6 + $0x48] sm:$0xff] %v616_v21  ;;  %v648_v25 = vmax.f32 %v616_v21, 0.0  ;;  %v387_v21 = vpop.permute.xlu2 %386 }
  0xb5   :  { %v192_v27 = vpop.f32.mrf.mxu2  ;;  %625 = vst [vmem:[%s1221_s6 + $0x10] sm:$0xff] %v609_v26  ;;  %v572_v29 = vpop.f32.mrf.mxu3  ;;  %v641_v40 = vmax.f32 %v609_v26, 0.0 }
  0xb6   :  { %v880_v28 = vpack.c.bf16 %v648_v25, %v647_v24  ;;  %v404_v30 = vmul.f32 %v367_v23, %v192_v27  ;;  %v174_v31 = vpop.f32.mrf.mxu0 }
  0xb7   :  { %v397_v33 = vmul.f32 %v332_v55, %v174_v31 }
  0xb8   :  { %900 = vst [vmem:[%s1222_s7 + $0x20] sm:$0xff] %v880_v28   ;;  %v597_v32 = vadd.f32 %v572_v29, %v404_v30  ;;  %v554_v34 = vpop.f32.mrf.mxu1 }
  0xb9   :  { %v590_v36 = vadd.f32 %v554_v34, %v397_v33 }
  0xba   :  { %v617_v35 = vadd.f32 %v1117_v58, %v597_v32  ;;  %v392_v32 = vpop.permute.xlu0 %391 }
  0xbb   :  { %v610_v37 = vadd.f32 %v1117_v58, %v590_v36 }
  0xbc   :  { %633 = vst [vmem:[%s1221_s6 + $0x50] sm:$0xff] %v617_v35  ;;  %v649_v52 = vmax.f32 %v617_v35, 0.0 }
  0xbd   :  { %v194_v39 = vpop.f32.mrf.mxu2  ;;  %626 = vst [vmem:[%s1221_s6 + $0x18] sm:$0xff] %v610_v37  ;;  %v642_v41 = vmax.f32 %v610_v37, 0.0  ;;  %v574_v43 = vpop.f32.mrf.mxu3 }
  0xbe   :  { %v405_v42 = vmul.f32 %v372_v38, %v194_v39  ;;  %v177_v44 = vpop.f32.mrf.mxu0 }
  0xbf   :  { %v865_v45 = vpack.c.bf16 %v642_v41, %v641_v40  ;;  %v398_v47 = vmul.f32 %v1110_v50, %v177_v44 }
  0xc0   :  { %v598_v46 = vadd.f32 %v574_v43, %v405_v42  ;;  %v557_v48 = vpop.f32.mrf.mxu1 }
  0xc1   :  { %897 = vst [vmem:[%s1222_s7 + $0x8] sm:$0xff] %v865_v45   ;;  %v591_v51 = vadd.f32 %v557_v48, %v398_v47 }
  0xc2   :  { %v618_v49 = vadd.f32 %v1117_v58, %v598_v46 }
  0xc3   :  { %v611_v55 = vadd.f32 %v1117_v58, %v591_v51 }
  0xc4   :  { %634 = vst [vmem:[%s1221_s6 + $0x58] sm:$0xff] %v618_v49  ;;  %v650_v54 = vmax.f32 %v618_v49, 0.0 }
  0xc5   :  { %v197_v57 = vpop.f32.mrf.mxu2  ;;  %627 = vst [vmem:[%s1221_s6 + $0x20] sm:$0xff] %v611_v55  ;;  %v577_v61 = vpop.f32.mrf.mxu3  ;;  %v643_v8 = vmax.f32 %v611_v55, 0.0 }
  0xc6   :  { %v885_v59 = vpack.c.bf16 %v650_v54, %v649_v52  ;;  %v406_v50 = vmul.f32 %v377_v56, %v197_v57  ;;  %v179_v62 = vpop.f32.mrf.mxu0 }
  0xc7   :  { %v399_v0 = vmul.f32 %v1112_v53, %v179_v62 }
  0xc8   :  { %901 = vst [vmem:[%s1222_s7 + $0x28] sm:$0xff] %v885_v59   ;;  %v599_v63 = vadd.f32 %v577_v61, %v406_v50  ;;  %v559_v1 = vpop.f32.mrf.mxu1 }
  0xc9   :  { %v592_v3 = vadd.f32 %v559_v1, %v399_v0 }
  0xca   :  { %v619_v2 = vadd.f32 %v1117_v58, %v599_v63 }
  0xcb   :  { %v612_v4 = vadd.f32 %v1117_v58, %v592_v3 }
  0xcc   :  { %635 = vst [vmem:[%s1221_s6 + $0x60] sm:$0xff] %v619_v2  ;;  %v651_v18 = vmax.f32 %v619_v2, 0.0 }
  0xcd   :  { %v199_v7 = vpop.f32.mrf.mxu2  ;;  %628 = vst [vmem:[%s1221_s6 + $0x28] sm:$0xff] %v612_v4  ;;  %v644_v9 = vmax.f32 %v612_v4, 0.0  ;;  %v579_v53 = vpop.f32.mrf.mxu3 }
  0xce   :  { %v407_v10 = vmul.f32 %v382_v5, %v199_v7  ;;  %v182_v11 = vpop.f32.mrf.mxu0 }
  0xcf   :  { %v870_v12 = vpack.c.bf16 %v644_v9, %v643_v8  ;;  %v400_v14 = vmul.f32 %v1119_v60, %v182_v11 }
  0xd0   :  { %v600_v13 = vadd.f32 %v579_v53, %v407_v10  ;;  %v562_v15 = vpop.f32.mrf.mxu1 }
  0xd1   :  { %898 = vst [vmem:[%s1222_s7 + $0x10] sm:$0xff] %v870_v12   ;;  %v593_v17 = vadd.f32 %v562_v15, %v400_v14 }
  0xd2   :  { %v620_v16 = vadd.f32 %v1117_v58, %v600_v13 }
  0xd3   :  { %v613_v20 = vadd.f32 %v1117_v58, %v593_v17 }
  0xd4   :  { %636 = vst [vmem:[%s1221_s6 + $0x68] sm:$0xff] %v620_v16  ;;  %v652_v19 = vmax.f32 %v620_v16, 0.0 }
  0xd5   :  { %v202_v22 = vpop.f32.mrf.mxu2  ;;  %629 = vst [vmem:[%s1221_s6 + $0x30] sm:$0xff] %v613_v20  ;;  %v582_v24 = vpop.f32.mrf.mxu3  ;;  %v645_v34 = vmax.f32 %v613_v20, 0.0 }
  0xd6   :  { %v890_v23 = vpack.c.bf16 %v652_v19, %v651_v18  ;;  %v408_v60 = vmul.f32 %v387_v21, %v202_v22  ;;  %v184_v25 = vpop.f32.mrf.mxu0 }
  0xd7   :  { %v401_v27 = vmul.f32 %v1125_v6, %v184_v25 }
  0xd8   :  { %902 = vst [vmem:[%s1222_s7 + $0x30] sm:$0xff] %v890_v23   ;;  %v601_v26 = vadd.f32 %v582_v24, %v408_v60  ;;  %v564_v28 = vpop.f32.mrf.mxu1 }
  0xd9   :  { %v594_v30 = vadd.f32 %v564_v28, %v401_v27 }
  0xda   :  { %v621_v29 = vadd.f32 %v1117_v58, %v601_v26 }
  0xdb   :  { %v614_v31 = vadd.f32 %v1117_v58, %v594_v30 }
  0xdc   :  { %637 = vst [vmem:[%s1221_s6 + $0x70] sm:$0xff] %v621_v29  ;;  %v653_v40 = vmax.f32 %v621_v29, 0.0 }
  0xdd   :  { %v204_v33 = vpop.f32.mrf.mxu2  ;;  %630 = vst [vmem:[%s1221_s6 + $0x38] sm:$0xff] %v614_v31  ;;  %v646_v35 = vmax.f32 %v614_v31, 0.0  ;;  %v584_v6 = vpop.f32.mrf.mxu3 }
  0xde   :  { %v409_v36 = vmul.f32 %v392_v32, %v204_v33 }
  0xdf   :  { %v875_v37 = vpack.c.bf16 %v646_v35, %v645_v34 }
  0xe0   :  { %v602_v38 = vadd.f32 %v584_v6, %v409_v36 }
  0xe1   :  { %899 = vst [vmem:[%s1222_s7 + $0x18] sm:$0xff] %v875_v37  }
  0xe2   :  { %v622_v39 = vadd.f32 %v1117_v58, %v602_v38 }
  0xe4   :  { %638 = vst [vmem:[%s1221_s6 + $0x78] sm:$0xff] %v622_v39  ;;  %v654_v41 = vmax.f32 %v622_v39, 0.0 }
  0xe6   :  { %v895_v42 = vpack.c.bf16 %v654_v41, %v653_v40 }
  0xe8   :  { %903 = vst [vmem:[%s1222_s7 + $0x38] sm:$0xff] %v895_v42  }

// kernel: mysage_forward.3
= control target key start
LH: loop header
LB: loop body
LE: loop exit
PB: predicated region body
PF: predicated region fallthrough
CT: control target
= control target key end

     0   :  { %v824_v2 = vmov 0   ;;  %s1082_s1 = inlined_call_operand.vmem [shape: bf16[128,128], index: 1, kind: input, shape index: {}]   ;;  %s1083_s3 = inlined_call_operand.vmem [shape: bf16[128,128], index: 3, kind: input, shape index: {}]   ;;  %s1084_s5 = inlined_call_operand.vmem [shape: f32[128,1], index: 5, kind: input, shape index: {}]   ;;  %s1085_s0 = inlined_call_operand.vmem [shape: bf16[128,128], index: 0, kind: input, shape index: {}]   ;;  %s1086_s2 = inlined_call_operand.vmem [shape: bf16[128,128], index: 2, kind: input, shape index: {}]   ;;  %s1087_s4 = inlined_call_operand.vmem [shape: f32[1,128], index: 4, kind: input, shape index: {}]   ;;  %s1088_s6 = inlined_call_operand.vmem [shape: f32[128,128], index: 6, kind: output, shape index: {}]  }
   0x1   :  { %v778_v0 = vld [vmem:[%s1082_s1 + $0x38] sm:$0xff]  ;;  %820 = vset.pattern.permute.xlu0 %v824_v2  ;;  %821 = vset.pattern.permute.xlu1 %v824_v2  ;;  %v777_v3 = vld [vmem:[%s1082_s1 + $0x30] sm:$0xff]  ;;  %v776_v5 = vld [vmem:[%s1082_s1 + $0x28] sm:$0xff] }
   0x2   :  { %v802_v1 = vld [vmem:[%s1083_s3 + $0x38] sm:$0xff]  ;;  %822 = vset.pattern.permute.xlu2 %v824_v2  ;;  %156 = vmatpush.bf16.msra.mxu0 %v778_v0  ;;  %v801_v4 = vld [vmem:[%s1083_s3 + $0x30] sm:$0xff]  ;;  %v296_v6 = vld [vmem:[%s1084_s5] sm:$0xff] }
   0x3   :  { %803 = vmatpush.bf16.msra.mxu2 %v778_v0  ;;  %811 = vmatpush.bf16.msra.mxu3 %v802_v1  ;;  %v800_v7 = vld [vmem:[%s1083_s3 + $0x28] sm:$0xff]  ;;  %v775_v8 = vld [vmem:[%s1082_s1 + $0x20] sm:$0xff]  ;;  %v298_v9 = vld [vmem:[%s1084_s5 + $0x10] sm:$0xff] }
   0x4   :  { %536 = vmatpush.bf16.msra.mxu1 %v802_v1  ;;  %314 = vperm.xlu0 %820, %v296_v6   ;;  %v799_v10 = vld [vmem:[%s1083_s3 + $0x20] sm:$0xff]  ;;  %v297_v11 = vld [vmem:[%s1084_s5 + $0x8] sm:$0xff]  ;;  %v774_v12 = vld [vmem:[%s1082_s1 + $0x18] sm:$0xff] }
   0x5   :  { %324 = vperm.xlu1 %821, %v298_v9   ;;  %v798_v13 = vld [vmem:[%s1083_s3 + $0x18] sm:$0xff]  ;;  %v773_v14 = vld [vmem:[%s1082_s1 + $0x10] sm:$0xff]  ;;  %v772_v18 = vld [vmem:[%s1082_s1 + $0x8] sm:$0xff] }
   0x6   :  { %157 = vmatpush.bf16.msra.mxu0 %v777_v3  ;;  %v299_v15 = vld [vmem:[%s1084_s5 + $0x18] sm:$0xff]  ;;  %v797_v16 = vld [vmem:[%s1083_s3 + $0x10] sm:$0xff]  ;;  %v796_v19 = vld [vmem:[%s1083_s3 + $0x8] sm:$0xff] }
   0x7   :  { %804 = vmatpush.bf16.msra.mxu2 %v777_v3  ;;  %812 = vmatpush.bf16.msra.mxu3 %v801_v4  ;;  %v302_v17 = vld [vmem:[%s1084_s5 + $0x30] sm:$0xff]  ;;  %v771_v20 = vld [vmem:[%s1082_s1] sm:$0xff]  ;;  %v303_v22 = vld [vmem:[%s1084_s5 + $0x38] sm:$0xff] }
   0x8   :  { %537 = vmatpush.bf16.msra.mxu1 %v801_v4  ;;  %v300_v21 = vld [vmem:[%s1084_s5 + $0x20] sm:$0xff]  ;;  %v305_v26 = vld [vmem:[%s1084_s5 + $0x48] sm:$0xff]  ;;  %v306_v30 = vld [vmem:[%s1084_s5 + $0x50] sm:$0xff] }
   0x9   :  { %v795_v23 = vld [vmem:[%s1083_s3] sm:$0xff]  ;;  %334 = vperm.xlu2 %822, %v300_v21   ;;  %v301_v29 = vld [vmem:[%s1084_s5 + $0x28] sm:$0xff]  ;;  %v311_v36 = vld [vmem:[%s1084_s5 + $0x78] sm:$0xff] }
   0xa   :  { %158 = vmatpush.bf16.msra.mxu0 %v776_v5  ;;  %v779_v24 = vld [vmem:[%s1085_s0] sm:$0xff]  ;;  %v309_v33 = vld [vmem:[%s1084_s5 + $0x68] sm:$0xff]  ;;  %v307_v39 = vld [vmem:[%s1084_s5 + $0x58] sm:$0xff] }
   0xb   :  { %805 = vmatpush.bf16.msra.mxu2 %v776_v5  ;;  %813 = vmatpush.bf16.msra.mxu3 %v800_v7  ;;  %v783_v25 = vld [vmem:[%s1085_s0 + $0x20] sm:$0xff]  ;;  %v780_v34 = vld [vmem:[%s1085_s0 + $0x8] sm:$0xff]  ;;  %v310_v40 = vld [vmem:[%s1084_s5 + $0x70] sm:$0xff] }
   0xc   :  { %538 = vmatpush.bf16.msra.mxu1 %v800_v7  ;;  %319 = vperm.xlu0 %820, %v297_v11   ;;  %v791_v27 = vld [vmem:[%s1086_s2 + $0x20] sm:$0xff]  ;;  %v784_v35 = vld [vmem:[%s1085_s0 + $0x28] sm:$0xff]  ;;  %v781_v41 = vld [vmem:[%s1085_s0 + $0x10] sm:$0xff] }
   0xd   :  { %329 = vperm.xlu1 %821, %v299_v15   ;;  %v787_v28 = vld [vmem:[%s1086_s2] sm:$0xff]  ;;  %v792_v37 = vld [vmem:[%s1086_s2 + $0x28] sm:$0xff]  ;;  %v785_v42 = vld [vmem:[%s1085_s0 + $0x30] sm:$0xff] }
   0xe   :  { %159 = vmatpush.bf16.msra.mxu0 %v775_v8  ;;  %v308_v31 = vld [vmem:[%s1084_s5 + $0x60] sm:$0xff]  ;;  %v788_v38 = vld [vmem:[%s1086_s2 + $0x8] sm:$0xff]  ;;  %v793_v43 = vld [vmem:[%s1086_s2 + $0x30] sm:$0xff] }
   0xf   :  { %806 = vmatpush.bf16.msra.mxu2 %v775_v8  ;;  %814 = vmatpush.bf16.msra.mxu3 %v799_v10  ;;  %v304_v32 = vld [vmem:[%s1084_s5 + $0x40] sm:$0xff]  ;;  %v789_v44 = vld [vmem:[%s1086_s2 + $0x10] sm:$0xff]  ;;  %v782_v45 = vld [vmem:[%s1085_s0 + $0x18] sm:$0xff] }
  0x10   :  { %539 = vmatpush.bf16.msra.mxu1 %v799_v10  ;;  %v786_v46 = vld [vmem:[%s1085_s0 + $0x38] sm:$0xff]  ;;  %v1009_v58 = vld [vmem:[%s1087_s4] ss:$0 sm:$0xff] }
  0x11   :  { %339 = vperm.xlu2 %822, %v301_v29   ;;  %v794_v47 = vld [vmem:[%s1086_s2 + $0x38] sm:$0xff] }
  0x12   :  { %160 = vmatpush.bf16.msra.mxu0 %v774_v12  ;;  %v790_v48 = vld [vmem:[%s1086_s2 + $0x18] sm:$0xff] }
  0x13   :  { %807 = vmatpush.bf16.msra.mxu2 %v774_v12  ;;  %815 = vmatpush.bf16.msra.mxu3 %v798_v13 }
  0x14   :  { %540 = vmatpush.bf16.msra.mxu1 %v798_v13  ;;  %344 = vperm.xlu0 %820, %v302_v17  }
  0x15   :  { %349 = vperm.xlu1 %821, %v303_v22  }
  0x16   :  { %161 = vmatpush.bf16.msra.mxu0 %v773_v14 }
  0x17   :  { %808 = vmatpush.bf16.msra.mxu2 %v773_v14  ;;  %816 = vmatpush.bf16.msra.mxu3 %v797_v16 }
  0x18   :  { %541 = vmatpush.bf16.msra.mxu1 %v797_v16 }
  0x19   :  { %354 = vperm.xlu2 %822, %v304_v32  }
  0x1a   :  { %162 = vmatpush.bf16.msra.mxu0 %v772_v18 }
  0x1b   :  { %809 = vmatpush.bf16.msra.mxu2 %v772_v18  ;;  %817 = vmatpush.bf16.msra.mxu3 %v796_v19 }
  0x1c   :  { %542 = vmatpush.bf16.msra.mxu1 %v796_v19  ;;  %359 = vperm.xlu0 %820, %v305_v26  }
  0x1d   :  { %364 = vperm.xlu1 %821, %v306_v30  }
  0x1e   :  { %163 = vmatpush.bf16.msra.mxu0 %v771_v20 }
  0x1f   :  { %810 = vmatpush.bf16.msra.mxu2 %v771_v20  ;;  %818 = vmatpush.bf16.msra.mxu3 %v795_v23 }
  0x20   :  { %543 = vmatpush.bf16.msra.mxu1 %v795_v23 }
  0x21   :  { %164 = vmatmul.bf16.vlgmr.msra.gmra.mxu0 %v779_v24  ;;  %369 = vperm.xlu2 %822, %v307_v39  }
  0x22   :  { %184 = vmatmul.bf16.vlgmr.msra.gmra.mxu2 %v783_v25  ;;  %564 = vmatmul.bf16.vlgmr.msra.gmra.mxu3 %v791_v27 }
  0x23   :  { %544 = vmatmul.bf16.vlgmr.msra.gmra.mxu1 %v787_v28 }
  0x24   :  { %374 = vperm.xlu0 %820, %v308_v31  }
  0x25   :  { %379 = vperm.xlu1 %821, %v309_v33  }
  0x29   :  { %384 = vperm.xlu2 %822, %v310_v40  }
  0x2c   :  { %389 = vperm.xlu0 %820, %v311_v36  }
  0x31   :  { %169 = vmatmul.bf16.gmra.mxu0 %v780_v34 }
  0x32   :  { %189 = vmatmul.bf16.gmra.mxu2 %v784_v35  ;;  %569 = vmatmul.bf16.gmra.mxu3 %v792_v37 }
  0x33   :  { %549 = vmatmul.bf16.gmra.mxu1 %v788_v38 }
  0x41   :  { %174 = vmatmul.bf16.gmra.mxu0 %v781_v41 }
  0x42   :  { %194 = vmatmul.bf16.gmra.mxu2 %v785_v42  ;;  %574 = vmatmul.bf16.gmra.mxu3 %v793_v43 }
  0x43   :  { %554 = vmatmul.bf16.gmra.mxu1 %v789_v44 }
  0x51   :  { %179 = vmatmul.bf16.gmra.mxu0 %v782_v45 }
  0x52   :  { %199 = vmatmul.bf16.gmra.mxu2 %v786_v46  ;;  %579 = vmatmul.bf16.gmra.mxu3 %v794_v47 }
  0x53   :  { %559 = vmatmul.bf16.gmra.mxu1 %v790_v48 }
  0x63   :  { %v335_v50 = vpop.permute.xlu2 %334 }
  0x6b   :  { %v1004_v53 = vpop.permute.xlu2 %339 }
  0x73   :  { %v355_v61 = vpop.permute.xlu2 %354 }
  0x76   :  { %v315_v49 = vpop.permute.xlu0 %314 }
  0x77   :  { %v325_v51 = vpop.permute.xlu1 %324 }
  0x7b   :  { %v370_v32 = vpop.permute.xlu2 %369 }
  0x7e   :  { %v320_v52 = vpop.permute.xlu0 %319 }
  0x7f   :  { %v330_v55 = vpop.permute.xlu1 %329 }
  0x86   :  { %v1011_v60 = vpop.permute.xlu0 %344 }
  0x87   :  { %v1017_v6 = vpop.permute.xlu1 %349 }
  0x8e   :  { %v360_v10 = vpop.permute.xlu0 %359 }
  0x8f   :  { %v365_v20 = vpop.permute.xlu1 %364 }
  0x96   :  { %v375_v43 = vpop.permute.xlu0 %374 }
  0x9e   :  { %v165_v54 = vpop.f32.mrf.mxu0 }
  0x9f   :  { %v392_v56 = vmul.f32 %v315_v49, %v165_v54 }
  0xa0   :  { %v545_v57 = vpop.f32.mrf.mxu1 }
  0xa1   :  { %v585_v59 = vadd.f32 %v545_v57, %v392_v56 }
  0xa3   :  { %v605_v62 = vadd.f32 %v1009_v58, %v585_v59 }
  0xa5   :  { %v185_v63 = vpop.f32.mrf.mxu2  ;;  %621 = vst [vmem:[%s1088_s6] sm:$0xff] %v605_v62  ;;  %v565_v0 = vpop.f32.mrf.mxu3 }
  0xa6   :  { %v400_v1 = vmul.f32 %v355_v61, %v185_v63  ;;  %v167_v2 = vpop.f32.mrf.mxu0 }
  0xa7   :  { %v393_v4 = vmul.f32 %v320_v52, %v167_v2 }
  0xa8   :  { %v593_v3 = vadd.f32 %v565_v0, %v400_v1  ;;  %v547_v5 = vpop.f32.mrf.mxu1 }
  0xa9   :  { %v586_v8 = vadd.f32 %v547_v5, %v393_v4 }
  0xaa   :  { %v613_v7 = vadd.f32 %v1009_v58, %v593_v3  ;;  %v385_v3 = vpop.permute.xlu2 %384 }
  0xab   :  { %v606_v9 = vadd.f32 %v1009_v58, %v586_v8 }
  0xac   :  { %629 = vst [vmem:[%s1088_s6 + $0x40] sm:$0xff] %v613_v7 }
  0xad   :  { %v187_v11 = vpop.f32.mrf.mxu2  ;;  %622 = vst [vmem:[%s1088_s6 + $0x8] sm:$0xff] %v606_v9  ;;  %v567_v13 = vpop.f32.mrf.mxu3 }
  0xae   :  { %v401_v12 = vmul.f32 %v360_v10, %v187_v11  ;;  %v170_v14 = vpop.f32.mrf.mxu0 }
  0xaf   :  { %v394_v16 = vmul.f32 %v325_v51, %v170_v14  ;;  %v390_v14 = vpop.permute.xlu0 %389 }
  0xb0   :  { %v594_v15 = vadd.f32 %v567_v13, %v401_v12  ;;  %v550_v17 = vpop.f32.mrf.mxu1 }
  0xb1   :  { %v587_v19 = vadd.f32 %v550_v17, %v394_v16 }
  0xb2   :  { %v614_v18 = vadd.f32 %v1009_v58, %v594_v15 }
  0xb3   :  { %v607_v21 = vadd.f32 %v1009_v58, %v587_v19 }
  0xb4   :  { %630 = vst [vmem:[%s1088_s6 + $0x48] sm:$0xff] %v614_v18 }
  0xb5   :  { %v190_v22 = vpop.f32.mrf.mxu2  ;;  %623 = vst [vmem:[%s1088_s6 + $0x10] sm:$0xff] %v607_v21  ;;  %v570_v23 = vpop.f32.mrf.mxu3 }
  0xb6   :  { %v402_v24 = vmul.f32 %v365_v20, %v190_v22  ;;  %v172_v25 = vpop.f32.mrf.mxu0 }
  0xb7   :  { %v395_v27 = vmul.f32 %v330_v55, %v172_v25  ;;  %v380_v55 = vpop.permute.xlu1 %379 }
  0xb8   :  { %v595_v26 = vadd.f32 %v570_v23, %v402_v24  ;;  %v552_v28 = vpop.f32.mrf.mxu1 }
  0xb9   :  { %v588_v30 = vadd.f32 %v552_v28, %v395_v27 }
  0xba   :  { %v615_v29 = vadd.f32 %v1009_v58, %v595_v26 }
  0xbb   :  { %v608_v31 = vadd.f32 %v1009_v58, %v588_v30 }
  0xbc   :  { %631 = vst [vmem:[%s1088_s6 + $0x50] sm:$0xff] %v615_v29 }
  0xbd   :  { %v192_v33 = vpop.f32.mrf.mxu2  ;;  %624 = vst [vmem:[%s1088_s6 + $0x18] sm:$0xff] %v608_v31  ;;  %v572_v35 = vpop.f32.mrf.mxu3 }
  0xbe   :  { %v403_v34 = vmul.f32 %v370_v32, %v192_v33  ;;  %v175_v36 = vpop.f32.mrf.mxu0 }
  0xbf   :  { %v396_v38 = vmul.f32 %v335_v50, %v175_v36 }
  0xc0   :  { %v596_v37 = vadd.f32 %v572_v35, %v403_v34  ;;  %v555_v39 = vpop.f32.mrf.mxu1 }
  0xc1   :  { %v589_v41 = vadd.f32 %v555_v39, %v396_v38 }
  0xc2   :  { %v616_v40 = vadd.f32 %v1009_v58, %v596_v37 }
  0xc3   :  { %v609_v42 = vadd.f32 %v1009_v58, %v589_v41 }
  0xc4   :  { %632 = vst [vmem:[%s1088_s6 + $0x58] sm:$0xff] %v616_v40 }
  0xc5   :  { %v195_v44 = vpop.f32.mrf.mxu2  ;;  %625 = vst [vmem:[%s1088_s6 + $0x20] sm:$0xff] %v609_v42  ;;  %v575_v46 = vpop.f32.mrf.mxu3 }
  0xc6   :  { %v404_v45 = vmul.f32 %v375_v43, %v195_v44  ;;  %v177_v47 = vpop.f32.mrf.mxu0 }
  0xc7   :  { %v397_v49 = vmul.f32 %v1004_v53, %v177_v47 }
  0xc8   :  { %v597_v48 = vadd.f32 %v575_v46, %v404_v45  ;;  %v557_v50 = vpop.f32.mrf.mxu1 }
  0xc9   :  { %v590_v52 = vadd.f32 %v557_v50, %v397_v49 }
  0xca   :  { %v617_v51 = vadd.f32 %v1009_v58, %v597_v48 }
  0xcb   :  { %v610_v54 = vadd.f32 %v1009_v58, %v590_v52 }
  0xcc   :  { %633 = vst [vmem:[%s1088_s6 + $0x60] sm:$0xff] %v617_v51 }
  0xcd   :  { %v197_v56 = vpop.f32.mrf.mxu2  ;;  %626 = vst [vmem:[%s1088_s6 + $0x28] sm:$0xff] %v610_v54  ;;  %v577_v59 = vpop.f32.mrf.mxu3 }
  0xce   :  { %v405_v57 = vmul.f32 %v380_v55, %v197_v56  ;;  %v180_v61 = vpop.f32.mrf.mxu0 }
  0xcf   :  { %v398_v62 = vmul.f32 %v1011_v60, %v180_v61 }
  0xd0   :  { %v598_v53 = vadd.f32 %v577_v59, %v405_v57  ;;  %v560_v63 = vpop.f32.mrf.mxu1 }
  0xd1   :  { %v591_v1 = vadd.f32 %v560_v63, %v398_v62 }
  0xd2   :  { %v618_v0 = vadd.f32 %v1009_v58, %v598_v53 }
  0xd3   :  { %v611_v2 = vadd.f32 %v1009_v58, %v591_v1 }
  0xd4   :  { %634 = vst [vmem:[%s1088_s6 + $0x68] sm:$0xff] %v618_v0 }
  0xd5   :  { %v200_v4 = vpop.f32.mrf.mxu2  ;;  %627 = vst [vmem:[%s1088_s6 + $0x30] sm:$0xff] %v611_v2  ;;  %v580_v7 = vpop.f32.mrf.mxu3 }
  0xd6   :  { %v406_v5 = vmul.f32 %v385_v3, %v200_v4  ;;  %v182_v8 = vpop.f32.mrf.mxu0 }
  0xd7   :  { %v399_v9 = vmul.f32 %v1017_v6, %v182_v8 }
  0xd8   :  { %v599_v60 = vadd.f32 %v580_v7, %v406_v5  ;;  %v562_v10 = vpop.f32.mrf.mxu1 }
  0xd9   :  { %v592_v12 = vadd.f32 %v562_v10, %v399_v9 }
  0xda   :  { %v619_v11 = vadd.f32 %v1009_v58, %v599_v60 }
  0xdb   :  { %v612_v13 = vadd.f32 %v1009_v58, %v592_v12 }
  0xdc   :  { %635 = vst [vmem:[%s1088_s6 + $0x70] sm:$0xff] %v619_v11 }
  0xdd   :  { %v202_v15 = vpop.f32.mrf.mxu2  ;;  %628 = vst [vmem:[%s1088_s6 + $0x38] sm:$0xff] %v612_v13  ;;  %v582_v17 = vpop.f32.mrf.mxu3 }
  0xde   :  { %v407_v16 = vmul.f32 %v390_v14, %v202_v15 }
  0xe0   :  { %v600_v18 = vadd.f32 %v582_v17, %v407_v16 }
  0xe2   :  { %v620_v6 = vadd.f32 %v1009_v58, %v600_v18 }
  0xe4   :  { %636 = vst [vmem:[%s1088_s6 + $0x78] sm:$0xff] %v620_v6 }

</bundles_post_ra>
